<compile_context>
chip_gen: v7x
topology: tpu7x:2x2x1
jax: 0.10.0
libtpu: 0.0.40
codegen_flags: <defaults>
</compile_context>

<pallas_src>
import math

import jax
import jax.numpy as jnp
from jax.experimental import pallas as pl
from jax.experimental.pallas import tpu as pltpu

NUM_CORNER_CH = 24   # first 24 channels get the 10x weight
_TILE_M = 512        # slab rows per grid step (~1.75 MiB per f32 tile at W=896)


def _corners3d_loss_kernel(scale_ref, p_ref, t_ref, o_ref):
    # scale_ref: (1, W) f32 periodic per-channel scale (broadcast over sublanes)
    # p_ref / t_ref / o_ref: (tile_m, W) lane-dense tiles
    d = p_ref[...].astype(jnp.float32) - t_ref[...].astype(jnp.float32)
    ad = jnp.abs(d)
    # SmoothL1 (beta = 1.0), reduction='none'
    sl1 = jnp.where(ad < 1.0, 0.5 * d * d, ad - 0.5)
    o_ref[...] = (sl1 * scale_ref[...]).astype(o_ref.dtype)


def corners_3d_loss(preds, targets):
    """preds, targets: (B, N, C) with C >= 26. Returns (B, N, C) loss."""
    assert preds.shape == targets.shape
    B, N, C = preds.shape
    assert C >= 26, "expected at least 24 corner + 2 center (+ depth) channels"

    # Lane-dense regrouping: G rows of C channels form one W-wide slab row,
    # with W = G * C a multiple of 128.
    G = math.lcm(C, 128) // C
    W = G * C

    rows = B * N
    pad_rows = (-rows) % G          # pad only up to a whole slab row (<= G-1 rows)
    rows_pad = rows + pad_rows
    M = rows_pad // G               # slab rows

    p_flat = preds.reshape(rows, C)
    t_flat = targets.reshape(rows, C)
    if pad_rows:
        # Zero padding -> diff 0 -> SmoothL1 0; padded rows are sliced off below.
        p_flat = jnp.pad(p_flat, ((0, pad_rows), (0, 0)))
        t_flat = jnp.pad(t_flat, ((0, pad_rows), (0, 0)))

    p2 = p_flat.reshape(M, W)
    t2 = t_flat.reshape(M, W)

    # Precomputed periodic per-channel scale: 10.0 for the first 24 channels of
    # each C-wide group, 1.0 otherwise.
    ch_scale = jnp.where(jnp.arange(C) < NUM_CORNER_CH, 10.0, 1.0).astype(jnp.float32)
    scale = jnp.tile(ch_scale, G).reshape(1, W)

    # Full-extent block for small inputs; otherwise 512-row tiles with a partial
    # boundary block (Pallas masks the boundary writeback, no array padding needed).
    tile_m = M if M < _TILE_M else _TILE_M
    grid_m = pl.cdiv(M, tile_m)

    out = pl.pallas_call(
        _corners3d_loss_kernel,
        out_shape=jax.ShapeDtypeStruct((M, W), preds.dtype),
        grid=(grid_m,),
        in_specs=[
            pl.BlockSpec((1, W), lambda i: (0, 0)),        # scale (resident, DMA'd once)
            pl.BlockSpec((tile_m, W), lambda i: (i, 0)),   # preds
            pl.BlockSpec((tile_m, W), lambda i: (i, 0)),   # targets
        ],
        out_specs=pl.BlockSpec((tile_m, W), lambda i: (i, 0)),
        compiler_params=pltpu.CompilerParams(
            dimension_semantics=("parallel",),
        ),
    )(scale, p2, t2)

    out = out.reshape(rows_pad, C)
    if pad_rows:
        out = out[:rows]
    return out.reshape(B, N, C)


def _reference(preds, targets):
    d = preds.astype(jnp.float32) - targets.astype(jnp.float32)
    ad = jnp.abs(d)
    sl1 = jnp.where(ad < 1.0, 0.5 * d * d, ad - 0.5)
    scale = jnp.where(jnp.arange(preds.shape[-1]) < NUM_CORNER_CH, 10.0, 1.0)
    return (sl1 * scale).astype(preds.dtype)


if __name__ == "__main__":
    key = jax.random.PRNGKey(0)

    # 1) Small shape consistent with the module: 24 corners + 2 projected center + 2 depth.
    k1, k2 = jax.random.split(key)
    B, N, C = 2, 8, 28
    preds = jax.random.normal(k1, (B, N, C), dtype=jnp.float32) * 2.0
    targets = jax.random.normal(k2, (B, N, C), dtype=jnp.float32) * 2.0

    out = jax.block_until_ready(corners_3d_loss(preds, targets))
    ref = _reference(preds, targets)
    assert out.shape == (B, N, C)
    assert jnp.allclose(out, ref, atol=1e-5, rtol=1e-5)

    # 2) Multi-tile path with input padding (rows % G != 0) and a partial last block.
    k3, k4 = jax.random.split(k2)
    B2, N2 = 2, 9000  # rows=18000 -> pad to 18016 -> M=563 -> grid=2 (partial last block)
    preds2 = jax.random.normal(k3, (B2, N2, C), dtype=jnp.float32) * 2.0
    targets2 = jax.random.normal(k4, (B2, N2, C), dtype=jnp.float32) * 2.0

    out2 = jax.block_until_ready(corners_3d_loss(preds2, targets2))
    ref2 = _reference(preds2, targets2)
    assert out2.shape == (B2, N2, C)
    assert jnp.allclose(out2, ref2, atol=1e-5, rtol=1e-5)

    # 3) Zero-copy path: rows % G == 0 (no padding) with a partial last tile.
    k5, k6 = jax.random.split(k4)
    B3, N3 = 2, 8336  # rows=16672 = 521*32 -> M=521 -> grid=2, no input pad/slice copies
    preds3 = jax.random.normal(k5, (B3, N3, C), dtype=jnp.float32) * 2.0
    targets3 = jax.random.normal(k6, (B3, N3, C), dtype=jnp.float32) * 2.0

    out3 = jax.block_until_ready(corners_3d_loss(preds3, targets3))
    ref3 = _reference(preds3, targets3)
    assert out3.shape == (B3, N3, C)
    assert jnp.allclose(out3, ref3, atol=1e-5, rtol=1e-5)

    print("KERNEL_OK")
</pallas_src>

<mosaic_0001>
module attributes {stable_mosaic.version = 11 : i64} {
  func.func @_corners3d_loss_kernel(%arg0: i32, %arg1: memref<1x896xf32, #tpu.memory_space<vmem>>, %arg2: memref<1x896xf32, #tpu.memory_space<vmem>>, %arg3: memref<1x896xf32, #tpu.memory_space<vmem>>, %arg4: memref<1x896xf32, #tpu.memory_space<vmem>>) attributes {dimension_semantics = [#tpu.dimension_semantics<parallel>], iteration_bounds = array<i64: 1>, scalar_prefetch = 0 : i64, scratch_operands = 0 : i64, tpu.core_type = #tpu.core_type<tc>, window_params = [{pipeline_mode = #tpu.pipeline_mode<synchronous>, transform_indices = @transform_0, window_bounds = array<i64: 1, 896>}, {transform_indices = @transform_1, window_bounds = array<i64: 1, 896>}, {transform_indices = @transform_2, window_bounds = array<i64: 1, 896>}, {transform_indices = @transform_3, window_bounds = array<i64: 1, 896>}]} {
    %c0 = arith.constant 0 : index
    %c0_0 = arith.constant 0 : index
    %0 = vector.load %arg2[%c0, %c0_0] : memref<1x896xf32, #tpu.memory_space<vmem>>, vector<1x896xf32>
    %c0_1 = arith.constant 0 : index
    %c0_2 = arith.constant 0 : index
    %1 = vector.load %arg3[%c0_1, %c0_2] : memref<1x896xf32, #tpu.memory_space<vmem>>, vector<1x896xf32>
    %2 = arith.subf %0, %1 : vector<1x896xf32>
    %3 = math.absf %2 : vector<1x896xf32>
    %cst = arith.constant 1.000000e+00 : f32
    %4 = vector.broadcast %cst : f32 to vector<1x896xf32>
    %5 = arith.cmpf olt, %3, %4 : vector<1x896xf32>
    %cst_3 = arith.constant 5.000000e-01 : f32
    %6 = vector.broadcast %cst_3 : f32 to vector<1x896xf32>
    %7 = arith.mulf %6, %2 : vector<1x896xf32>
    %8 = arith.mulf %7, %2 : vector<1x896xf32>
    %cst_4 = arith.constant 5.000000e-01 : f32
    %9 = vector.broadcast %cst_4 : f32 to vector<1x896xf32>
    %10 = arith.subf %3, %9 : vector<1x896xf32>
    %11 = arith.select %5, %8, %10 : vector<1x896xi1>, vector<1x896xf32>
    %c0_5 = arith.constant 0 : index
    %c0_6 = arith.constant 0 : index
    %12 = vector.load %arg1[%c0_5, %c0_6] : memref<1x896xf32, #tpu.memory_space<vmem>>, vector<1x896xf32>
    %13 = arith.mulf %11, %12 : vector<1x896xf32>
    %c0_7 = arith.constant 0 : index
    %c0_8 = arith.constant 0 : index
    %14 = vector.load %arg4[%c0_7, %c0_8] : memref<1x896xf32, #tpu.memory_space<vmem>>, vector<1x896xf32>
    tpu.vector_store %arg4[%c0_7, %c0_8], %13 {strides = array<i32>} : memref<1x896xf32, #tpu.memory_space<vmem>>, vector<1x896xf32>,
    return
  }
  func.func @transform_0(%arg0: i32) -> (i32, i32) {
    %c0_i32 = arith.constant 0 : i32
    %c0_i32_0 = arith.constant 0 : i32
    %c0_i32_1 = arith.constant 0 : i32
    return %c0_i32, %c0_i32_0 : i32, i32
  }
  func.func @transform_1(%arg0: i32) -> (i32, i32) {
    %c0_i32 = arith.constant 0 : i32
    %c0_i32_0 = arith.constant 0 : i32
    return %arg0, %c0_i32 : i32, i32
  }
  func.func @transform_2(%arg0: i32) -> (i32, i32) {
    %c0_i32 = arith.constant 0 : i32
    %c0_i32_0 = arith.constant 0 : i32
    return %arg0, %c0_i32 : i32, i32
  }
  func.func @transform_3(%arg0: i32) -> (i32, i32) {
    %c0_i32 = arith.constant 0 : i32
    %c0_i32_0 = arith.constant 0 : i32
    return %arg0, %c0_i32 : i32, i32
  }
}

</mosaic_0001>

<bundles_post_ra>
// kernel: tpu_custom_call.1
= control target key start
LH: loop header
LB: loop body
LE: loop exit
PB: predicated region body
PF: predicated region fallthrough
CT: control target
= control target key end

     0   :  { %8 = vsyncpa [#allocation3], 0  ;;  %s209_s0 = inlined_call_operand.hbm [shape: f32[1,896], index: 0, kind: input, shape index: {}]   ;;  %s210_s1 = inlined_call_operand.hbm [shape: f32[1,896], index: 1, kind: input, shape index: {}]   ;;  %s211_s2 = inlined_call_operand.vmem [shape: f32[1,896], index: 2, kind: input, shape index: {}]   ;;  %s212_s3 = inlined_call_operand.hbm [shape: f32[1,896], index: 3, kind: output, shape index: {}]  }
   0x1   :  { %9 = vsyncpa [#allocation6], 0 }
   0x2   :  { %10 = vsyncpa [#allocation4], 0  ;;  %s147_s12 = smov [#allocation2]   ;;  %s148_s14 = smov [#allocation5]  }
   0x3   :  { %s17_s13 = sshll.u32 %s147_s12, 4  ;;  %s27_s15 = sshll.u32 %s148_s14, 4  ;;  %s18_s13 = int_to_ptr.vmem [resolvable:$true] %s17_s13  ;;  %s28_s15 = int_to_ptr.vmem [resolvable:$true] %s27_s15 }
   0x4   :  { %s75_s18 = scalar_lea.hbm %s209_s0, 112 }
   0x5   :  { %p76_p0 = scmp.ne.s32.totalorder %s209_s0, %s75_s18  ;;  %p79_p1 = scmp.lt.u32.totalorder %s75_s18, %s209_s0 }
   0x7   :  { %p81_p2 = pnand %p79_p1, %p76_p0 }
   0x9   :  { %84 = shalt.err (!%p81_p2)
}
   0xa   :  { %s85_s23 = scalar_lea.vmem %s18_s13, 112  ;;  %s89_s24 = scalar_lea.vmem %s18_s13, 128 }
   0xb   :  { %p86_p3 = scmp.ne.s32.totalorder %s18_s13, %s85_s23  ;;  %p90_p4 = scmp.lt.s32.totalorder %s18_s13, %s18_s13 }
   0xc   :  { %p91_p5 = scmp.lt.s32.totalorder %s89_s24, %s85_s23 }
   0xe   :  { %p92_p6 = por %p91_p5, %p90_p4 }
  0x10   :  { %p93_p7 = pnand %p92_p6, %p86_p3 }
  0x12   :  { %96 = shalt.err (!%p93_p7)
}
  0x13   :  { %20 = dma.hbm_to_vmem [thread:$0]  %s209_s0, 112, %s18_s13, [#allocation3]  }
  0x14   :  { %s97_s29 = scalar_lea.hbm %s210_s1, 112 }
  0x15   :  { %p98_p8 = scmp.ne.s32.totalorder %s210_s1, %s97_s29  ;;  %p101_p9 = scmp.lt.u32.totalorder %s97_s29, %s210_s1 }
  0x17   :  { %p103_p10 = pnand %p101_p9, %p98_p8 }
  0x19   :  { %106 = shalt.err (!%p103_p10)
}
  0x1a   :  { %s107_s7 = scalar_lea.vmem %s28_s15, 112  ;;  %s111_s8 = scalar_lea.vmem %s28_s15, 128 }
  0x1b   :  { %p108_p11 = scmp.ne.s32.totalorder %s28_s15, %s107_s7  ;;  %p112_p12 = scmp.lt.s32.totalorder %s28_s15, %s28_s15 }
  0x1c   :  { %p113_p13 = scmp.lt.s32.totalorder %s111_s8, %s107_s7 }
  0x1e   :  { %p114_p0 = por %p113_p13, %p112_p12 }
  0x20   :  { %p115_p1 = pnand %p114_p0, %p108_p11 }
  0x22   :  { %118 = shalt.err (!%p115_p1)
}
  0x23   :  { %30 = dma.hbm_to_vmem [thread:$0]  %s210_s1, 112, %s28_s15, [#allocation6]  }
  0x24   :  { %141 = dma.done.wait [#allocation3], 112  }
  0x25   :  { %142 = vsyncadd [#allocation3], 4294967184 }
  0x26   :  { %143 = dma.done.wait [#allocation6], 112  }
  0x27   :  { %144 = vsyncadd [#allocation6], 4294967184  ;;  %v39_v0 = vld [vmem:[#allocation5] sm:$0xff]  ;;  %v40_v1 = vld [vmem:[%s211_s2] sm:$0xff]  ;;  %v50_v5 = vlaneseq  ;;  %s149_s12 = smov [#allocation7]  }
  0x28   :  { %v41_v2 = vsub.f32 %v39_v0, %v40_v1  ;;  %v48_v8 = vld [vmem:[#allocation2] sm:$0xff]  ;;  %s61_s13 = sshll.u32 %s149_s12, 4  ;;  %s62_s13 = int_to_ptr.vmem [resolvable:$true] %s61_s13 }
  0x29   :  { %vm52_vm1 = vcmp.lt.s32.totalorder %v50_v5, 896  ;;  %s119_s1 = scalar_lea.vmem %s62_s13, 112  ;;  %s123_s14 = scalar_lea.vmem %s62_s13, 128 }
  0x2a   :  { %v42_v3 = vand.u32 2147483647, %v41_v2  ;;  %v44_v4 = vmul.f32 0.5, %v41_v2  ;;  %p120_p2 = scmp.ne.s32.totalorder %s62_s13, %s119_s1  ;;  %p124_p3 = scmp.lt.s32.totalorder %s62_s13, %s62_s13 }
  0x2b   :  { %p125_p4 = scmp.lt.s32.totalorder %s123_s14, %s119_s1 }
  0x2c   :  { %vm43_vm0 = vcmp.lt.f32.partialorder %v42_v3, 1.0  ;;  %v45_v6 = vmul.f32 %v44_v4, %v41_v2  ;;  %v71_v7 = vadd.f32 -0.5, %v42_v3 }
  0x2d   :  { %p126_p5 = por %p125_p4, %p124_p3 }
  0x2e   :  { %v47_v9 = vsel %vm43_vm0, %v45_v6, %v71_v7 }
  0x2f   :  { %v49_v10 = vmul.f32 %v48_v8, %v47_v9  ;;  %p127_p6 = pnand %p126_p5, %p120_p2 }
  0x31   :  { %54 = vst.msk [vmem:[#allocation7] sm:$0x7f] %vm52_vm1, %v49_v10 }
  0x32   :  { %130 = shalt.err (!%p127_p6)
}
  0x33   :  { %s131_s16 = scalar_lea.hbm %s212_s3, 112 }
  0x34   :  { %p132_p7 = scmp.ne.s32.totalorder %s212_s3, %s131_s16  ;;  %p135_p8 = scmp.lt.u32.totalorder %s131_s16, %s212_s3 }
  0x36   :  { %p137_p9 = pnand %p135_p8, %p132_p7 }
  0x38   :  { %140 = shalt.err (!%p137_p9)
}
  0x39   :  { %64 = dma.vmem_to_hbm [thread:$0]  %s62_s13, 112, %s212_s3, [#allocation4]  }
  0x3a   :  { %145 = dma.done.wait [#allocation4], 112  }
  0x3b   :  { %146 = vsyncadd [#allocation4], 4294967184 }
  0x3c   :  { %68 = vsyncpa [#allocation3], 1 }
  0x3d   :  { %69 = vsyncpa [#allocation6], 1 }
  0x3e   :  { %70 = vsyncpa [#allocation4], 1 }

</bundles_post_ra>
